<compile_context>
chip_gen: v5e
topology: v5e:2x2
jax: 0.10.0
libtpu: 0.0.40
codegen_flags: <defaults>
</compile_context>

<pallas_src>
import math

import jax
import jax.numpy as jnp
from jax.experimental import pallas as pl
from jax.experimental.pallas import tpu as pltpu


def _fused_encoder_kernel(blk_off_ref, blk_cnt_ref,   # scalar prefetch (SMEM)
                          x_ref, w_ref, b_ref,        # inputs (VMEM tiles)
                          o_ref,                      # output tile
                          acc_ref):                   # f32 accumulator scratch
    m = pl.program_id(0)                 # modality
    k = pl.program_id(1)                 # K tile index
    n_valid = blk_cnt_ref[m]             # number of real K tiles for modality m

    @pl.when(k == 0)
    def _init():
        # Fold the bias into the accumulator init: epilogue is then pure
        # normalization.  b_ref block is [1, 1, E] (f32).
        acc_ref[...] = jnp.broadcast_to(b_ref[0], acc_ref.shape)

    # Skip accumulation on padded trailing K steps; the index map clamps the
    # block index there, so the pipeline re-uses the resident block (no DMA).
    @pl.when(k < n_valid)
    def _accumulate():
        acc_ref[...] += jnp.dot(x_ref[...], w_ref[...],
                                preferred_element_type=jnp.float32)

    @pl.when(k == pl.num_programs(1) - 1)
    def _finalize():
        y = acc_ref[...]                                    # [B, E], f32
        # torch.nn.functional.normalize(p=2, dim=-1): y / max(||y||_2, 1e-12)
        sumsq = jnp.sum(y * y, axis=-1, keepdims=True)
        inv_norm = jax.lax.rsqrt(jnp.maximum(sumsq, 1e-24))
        o_ref[0] = (y * inv_norm).astype(o_ref.dtype)


def _fused_encode_normalize(entries, *, tk=256):
    """entries: list of (x [B, D_m], w [D_m, E], b [E]) for active modalities.

    Returns a list of L2-normalized [B, E] float32 embeddings (one per entry),
    computed by a single fused pallas_call.
    """
    num_mod = len(entries)
    B = entries[0][0].shape[0]
    E = entries[0][1].shape[1]

    x_parts, w_parts, b_parts = [], [], []
    blk_off_l, blk_cnt_l = [], []
    blocks = 0
    for x, w, b in entries:
        assert x.shape[0] == B and w.shape[0] == x.shape[1] and w.shape[1] == E
        D = x.shape[1]
        n = -(-D // tk)                      # ceil-div: K tiles for this modality
        pad = n * tk - D
        # Pad in the native dtype, cast to bf16 once (no f32 round trip).
        x_parts.append(jnp.pad(x, ((0, 0), (0, pad))).astype(jnp.bfloat16))
        w_parts.append(jnp.pad(w, ((0, pad), (0, 0))).astype(jnp.bfloat16))
        b_parts.append(jnp.reshape(b, (1, E)).astype(jnp.float32))
        blk_off_l.append(blocks)
        blk_cnt_l.append(n)
        blocks += n

    x_cat = jnp.concatenate(x_parts, axis=1)          # [B, blocks*tk]   bf16
    w_cat = jnp.concatenate(w_parts, axis=0)          # [blocks*tk, E]   bf16
    b_cat = jnp.stack(b_parts, axis=0)                # [num_mod, 1, E]  f32
    blk_off = jnp.asarray(blk_off_l, dtype=jnp.int32)
    blk_cnt = jnp.asarray(blk_cnt_l, dtype=jnp.int32)
    max_blocks = max(blk_cnt_l)

    # Clamped K index: padded trailing steps re-use the last valid block.
    def x_map(m, k, off, cnt):
        return (0, off[m] + jnp.minimum(k, cnt[m] - 1))

    def w_map(m, k, off, cnt):
        return (off[m] + jnp.minimum(k, cnt[m] - 1), 0)

    def b_map(m, k, off, cnt):
        return (m, 0, 0)

    def o_map(m, k, off, cnt):
        return (m, 0, 0)

    flops = 2 * B * (blocks * tk) * E
    bytes_accessed = (x_cat.size * 2 + w_cat.size * 2
                      + b_cat.size * 4 + num_mod * B * E * 4)

    out = pl.pallas_call(
        _fused_encoder_kernel,
        out_shape=jax.ShapeDtypeStruct((num_mod, B, E), jnp.float32),
        grid_spec=pltpu.PrefetchScalarGridSpec(
            num_scalar_prefetch=2,
            grid=(num_mod, max_blocks),
            in_specs=[
                pl.BlockSpec((B, tk), x_map),
                pl.BlockSpec((tk, E), w_map),
                pl.BlockSpec((1, 1, E), b_map),
            ],
            out_specs=pl.BlockSpec((1, B, E), o_map),
            scratch_shapes=[pltpu.VMEM((B, E), jnp.float32)],
        ),
        compiler_params=pltpu.CompilerParams(
            # modality axis splits across TensorCores (v7x megacore);
            # K is a reduction into the resident accumulator -> "arbitrary".
            dimension_semantics=("parallel", "arbitrary"),
        ),
        cost_estimate=pl.CostEstimate(
            flops=flops,
            transcendentals=num_mod * B,
            bytes_accessed=bytes_accessed,
        ),
    )(blk_off, blk_cnt, x_cat, w_cat, b_cat)

    return [out[i] for i in range(num_mod)]


def simple_clip_forward(params, image_input, dna_input, language_input, *, tk=256):
    """Mirrors SimpleCLIP.forward (open_clip_model=None branch).

    image_input: [B, C, H, W] float32 (NCHW, flattened inside)
    dna_input:   [B, S, 4]    float32 (flattened inside)
    language_input: [B, H_lang] float32
    Returns (image_output, dna_output, language_output, logit_scale.exp(), logit_bias).
    """
    B = image_input.shape[0]

    order, entries = [], []
    if params.get("image") is not None:
        order.append("image")
        entries.append((image_input.reshape(B, -1),
                        params["image"]["w"], params["image"]["b"]))
    if params.get("dna") is not None:
        order.append("dna")
        entries.append((dna_input.reshape(B, -1),
                        params["dna"]["w"], params["dna"]["b"]))
    if params.get("language") is not None:
        order.append("language")
        entries.append((language_input,
                        params["language"]["w"], params["language"]["b"]))

    outs = _fused_encode_normalize(entries, tk=tk) if entries else []
    by_name = dict(zip(order, outs))

    logit_scale_exp = jnp.exp(params["logit_scale"])
    logit_bias = params["logit_bias"]          # None (init_logit_bias=None)
    return (by_name.get("image"), by_name.get("dna"), by_name.get("language"),
            logit_scale_exp, logit_bias)


def _init_linear(key, d_in, d_out, scale=0.02):
    kw, kb = jax.random.split(key)
    return {
        # Weights stored / streamed as bf16 (mem-bound kernel); bias stays f32.
        "w": (scale * jax.random.normal(kw, (d_in, d_out), dtype=jnp.float32)
              ).astype(jnp.bfloat16),
        "b": scale * jax.random.normal(kb, (d_out,), dtype=jnp.float32),
    }


def _ref_encode(x, w, b):
    """Pure-JAX reference matching the kernel's bf16-operand / f32-accum path."""
    y = (x.astype(jnp.bfloat16).astype(jnp.float32)
         @ w.astype(jnp.float32)) + b.reshape(1, -1)
    n = jnp.linalg.norm(y, axis=-1, keepdims=True)
    return y / jnp.maximum(n, 1e-12)


if __name__ == "__main__":
    key = jax.random.PRNGKey(0)
    k_img, k_dna, k_lang, k_xi, k_xd, k_xl = jax.random.split(key, 6)

    # Small shapes consistent with the forward pass.
    B, C, H, W = 2, 4, 16, 16          # image NCHW
    SEQ = 8                            # dna sequence length (4-channel)
    H_LANG = 32                        # language hidden size
    EMBED = 128                        # shared CLIP embedding dim (lane-dense)

    params = {
        "image": _init_linear(k_img, C * H * W, EMBED),
        "dna": _init_linear(k_dna, SEQ * 4, EMBED),
        "language": _init_linear(k_lang, H_LANG, EMBED),
        "logit_scale": jnp.asarray(math.log(1.0 / 0.07), dtype=jnp.float32),
        "logit_bias": None,            # init_logit_bias=None in the module
    }

    image_input = jax.random.normal(k_xi, (B, C, H, W), dtype=jnp.float32)
    dna_input = jax.random.normal(k_xd, (B, SEQ, 4), dtype=jnp.float32)
    language_input = jax.random.normal(k_xl, (B, H_LANG), dtype=jnp.float32)

    img_out, dna_out, lang_out, scale_exp, logit_bias = simple_clip_forward(
        params, image_input, dna_input, language_input, tk=256
    )
    jax.block_until_ready((img_out, dna_out, lang_out, scale_exp))

    # Sanity checks: shapes, unit-norm rows, agreement with pure-JAX reference.
    refs = (
        _ref_encode(image_input.reshape(B, -1),
                    params["image"]["w"], params["image"]["b"]),
        _ref_encode(dna_input.reshape(B, -1),
                    params["dna"]["w"], params["dna"]["b"]),
        _ref_encode(language_input,
                    params["language"]["w"], params["language"]["b"]),
    )
    for out, ref in zip((img_out, dna_out, lang_out), refs):
        assert out.shape == (B, EMBED)
        norms = jnp.linalg.norm(out, axis=-1)
        assert jnp.allclose(norms, 1.0, atol=1e-4), norms
        assert jnp.allclose(out, ref, atol=2e-3, rtol=2e-3), \
            float(jnp.max(jnp.abs(out - ref)))
    assert jnp.allclose(scale_exp, 1.0 / 0.07, rtol=1e-5)
    assert logit_bias is None

    print("KERNEL_OK")
</pallas_src>

<mosaic_0001>
module attributes {stable_mosaic.version = 11 : i64} {
  func.func @_fused_encoder_kernel(%arg0: i32, %arg1: i32, %arg2: memref<3xi32, #tpu.memory_space<smem>>, %arg3: memref<3xi32, #tpu.memory_space<smem>>, %arg4: memref<2x256xbf16, #tpu.memory_space<vmem>>, %arg5: memref<256x128xbf16, #tpu.memory_space<vmem>>, %arg6: memref<1x1x128xf32, #tpu.memory_space<vmem>>, %arg7: memref<1x2x128xf32, #tpu.memory_space<vmem>>, %arg8: memref<2x128xf32, #tpu.memory_space<vmem>>) attributes {dimension_semantics = [#tpu.dimension_semantics<parallel>, #tpu.dimension_semantics<arbitrary>], iteration_bounds = array<i64: 3, 4>, scalar_prefetch = 2 : i64, scratch_operands = 1 : i64, tpu.core_type = #tpu.core_type<tc>, window_params = [{transform_indices = @transform_0, window_bounds = array<i64: 2, 256>}, {transform_indices = @transform_1, window_bounds = array<i64: 256, 128>}, {transform_indices = @transform_2, window_bounds = array<i64: 1, 1, 128>}, {transform_indices = @transform_3, window_bounds = array<i64: 1, 2, 128>}]} {
    %0 = arith.index_cast %arg0 : i32 to index
    %1 = memref.load %arg3[%0] : memref<3xi32, #tpu.memory_space<smem>>
    %c0_i32 = arith.constant 0 : i32
    %2 = arith.cmpi eq, %arg1, %c0_i32 : i32
    %3 = arith.extui %2 : i1 to i32
    %c0_i32_0 = arith.constant 0 : i32
    %4 = arith.cmpi ne, %3, %c0_i32_0 : i32
    scf.if %4 {
      %c0 = arith.constant 0 : index
      %c0_3 = arith.constant 0 : index
      %c0_4 = arith.constant 0 : index
      %11 = vector.load %arg6[%c0, %c0_3, %c0_4] : memref<1x1x128xf32, #tpu.memory_space<vmem>>, vector<1x1x128xf32>
      %12 = vector.shape_cast %11 : vector<1x1x128xf32> to vector<1x128xf32>
      %13 = vector.shape_cast %12 : vector<1x128xf32> to vector<1x128xf32>
      %14 = vector.broadcast %13 : vector<1x128xf32> to vector<2x128xf32>
      %c0_5 = arith.constant 0 : index
      %c0_6 = arith.constant 0 : index
      %15 = vector.load %arg8[%c0_5, %c0_6] : memref<2x128xf32, #tpu.memory_space<vmem>>, vector<2x128xf32>
      tpu.vector_store %arg8[%c0_5, %c0_6], %14 {strides = array<i32>} : memref<2x128xf32, #tpu.memory_space<vmem>>, vector<2x128xf32>,
    } else {
    }
    %5 = arith.cmpi slt, %arg1, %1 : i32
    %6 = arith.extui %5 : i1 to i32
    %c0_i32_1 = arith.constant 0 : i32
    %7 = arith.cmpi ne, %6, %c0_i32_1 : i32
    scf.if %7 {
      %c0 = arith.constant 0 : index
      %c0_3 = arith.constant 0 : index
      %11 = vector.load %arg8[%c0, %c0_3] : memref<2x128xf32, #tpu.memory_space<vmem>>, vector<2x128xf32>
      %c0_4 = arith.constant 0 : index
      %c0_5 = arith.constant 0 : index
      %12 = vector.load %arg4[%c0_4, %c0_5] : memref<2x256xbf16, #tpu.memory_space<vmem>>, vector<2x256xbf16>
      %c0_6 = arith.constant 0 : index
      %c0_7 = arith.constant 0 : index
      %13 = vector.load %arg5[%c0_6, %c0_7] : memref<256x128xbf16, #tpu.memory_space<vmem>>, vector<256x128xbf16>
      %cst = arith.constant dense<0.000000e+00> : vector<2x128xf32>
      %14 = tpu.matmul %12, %13, %cst {dimension_numbers = #tpu.dot_dimension_numbers<[1], [0], [0], [1], [0, 0, 1, 1], [], []>} : vector<2x256xbf16>, vector<256x128xbf16>, vector<2x128xf32> -> vector<2x128xf32>
      %15 = arith.addf %11, %14 : vector<2x128xf32>
      %c0_8 = arith.constant 0 : index
      %c0_9 = arith.constant 0 : index
      %16 = vector.load %arg8[%c0_8, %c0_9] : memref<2x128xf32, #tpu.memory_space<vmem>>, vector<2x128xf32>
      tpu.vector_store %arg8[%c0_8, %c0_9], %15 {strides = array<i32>} : memref<2x128xf32, #tpu.memory_space<vmem>>, vector<2x128xf32>,
    } else {
    }
    %c3_i32 = arith.constant 3 : i32
    %8 = arith.cmpi eq, %arg1, %c3_i32 : i32
    %9 = arith.extui %8 : i1 to i32
    %c0_i32_2 = arith.constant 0 : i32
    %10 = arith.cmpi ne, %9, %c0_i32_2 : i32
    scf.if %10 {
      %c0 = arith.constant 0 : index
      %c0_3 = arith.constant 0 : index
      %11 = vector.load %arg8[%c0, %c0_3] : memref<2x128xf32, #tpu.memory_space<vmem>>, vector<2x128xf32>
      %12 = arith.mulf %11, %11 : vector<2x128xf32>
      %cst = arith.constant dense<0.000000e+00> : vector<2xf32>
      %13 = vector.multi_reduction <add>, %12, %cst [1] : vector<2x128xf32> to vector<2xf32>
      %14 = vector.shape_cast %13 : vector<2xf32> to vector<2x1xf32>
      %cst_4 = arith.constant 1.000000e-24 : f32
      %15 = vector.broadcast %cst_4 : f32 to vector<2x1xf32>
      %16 = arith.maximumf %14, %15 : vector<2x1xf32>
      %17 = math.rsqrt %16 : vector<2x1xf32>
      %18 = vector.broadcast %17 : vector<2x1xf32> to vector<2x128xf32>
      %19 = arith.mulf %11, %18 : vector<2x128xf32>
      %c0_5 = arith.constant 0 : index
      %c0_6 = arith.constant 0 : index
      %c0_7 = arith.constant 0 : index
      %20 = vector.load %arg7[%c0_5, %c0_6, %c0_7] : memref<1x2x128xf32, #tpu.memory_space<vmem>>, vector<1x2x128xf32>
      %21 = vector.shape_cast %20 : vector<1x2x128xf32> to vector<2x128xf32>
      %22 = vector.shape_cast %19 : vector<2x128xf32> to vector<1x2x128xf32>
      tpu.vector_store %arg7[%c0_5, %c0_6, %c0_7], %22 {strides = array<i32>} : memref<1x2x128xf32, #tpu.memory_space<vmem>>, vector<1x2x128xf32>,
    } else {
    }
    return
  }
  func.func @transform_0(%arg0: i32, %arg1: i32, %arg2: memref<3xi32, #tpu.memory_space<smem>>, %arg3: memref<3xi32, #tpu.memory_space<smem>>) -> (i32, i32) {
    %0 = arith.index_cast %arg0 : i32 to index
    %1 = memref.load %arg2[%0] : memref<3xi32, #tpu.memory_space<smem>>
    %2 = arith.index_cast %arg0 : i32 to index
    %3 = memref.load %arg3[%2] : memref<3xi32, #tpu.memory_space<smem>>
    %c1_i32 = arith.constant 1 : i32
    %4 = arith.subi %3, %c1_i32 : i32
    %5 = arith.minsi %arg1, %4 : i32
    %6 = arith.addi %1, %5 : i32
    %c0_i32 = arith.constant 0 : i32
    %c0_i32_0 = arith.constant 0 : i32
    return %c0_i32, %6 : i32, i32
  }
  func.func @transform_1(%arg0: i32, %arg1: i32, %arg2: memref<3xi32, #tpu.memory_space<smem>>, %arg3: memref<3xi32, #tpu.memory_space<smem>>) -> (i32, i32) {
    %0 = arith.index_cast %arg0 : i32 to index
    %1 = memref.load %arg2[%0] : memref<3xi32, #tpu.memory_space<smem>>
    %2 = arith.index_cast %arg0 : i32 to index
    %3 = memref.load %arg3[%2] : memref<3xi32, #tpu.memory_space<smem>>
    %c1_i32 = arith.constant 1 : i32
    %4 = arith.subi %3, %c1_i32 : i32
    %5 = arith.minsi %arg1, %4 : i32
    %6 = arith.addi %1, %5 : i32
    %c0_i32 = arith.constant 0 : i32
    %c0_i32_0 = arith.constant 0 : i32
    return %6, %c0_i32 : i32, i32
  }
  func.func @transform_2(%arg0: i32, %arg1: i32, %arg2: memref<3xi32, #tpu.memory_space<smem>>, %arg3: memref<3xi32, #tpu.memory_space<smem>>) -> (i32, i32, i32) {
    %c0_i32 = arith.constant 0 : i32
    %c0_i32_0 = arith.constant 0 : i32
    %c0_i32_1 = arith.constant 0 : i32
    return %arg0, %c0_i32, %c0_i32_0 : i32, i32, i32
  }
  func.func @transform_3(%arg0: i32, %arg1: i32, %arg2: memref<3xi32, #tpu.memory_space<smem>>, %arg3: memref<3xi32, #tpu.memory_space<smem>>) -> (i32, i32, i32) {
    %c0_i32 = arith.constant 0 : i32
    %c0_i32_0 = arith.constant 0 : i32
    %c0_i32_1 = arith.constant 0 : i32
    return %arg0, %c0_i32, %c0_i32_0 : i32, i32, i32
  }
}

</mosaic_0001>

<bundles_post_ra>
// kernel: tpu_custom_call.1
= control target key start
LH: loop header
LB: loop body
LE: loop exit
PB: predicated region body
PF: predicated region fallthrough
CT: control target
= control target key end

     0   :  { %s1152_s24 = smov [#allocation4]   ;;  %s1153_s25 = smov [#allocation5]   ;;  %s1578_s0 = inlined_call_operand.hbm [shape: s32[3], index: 0, kind: input, shape index: {}]   ;;  %s1579_s2 = inlined_call_operand.hbm [shape: bf16[2,1536], index: 2, kind: input, shape index: {}]   ;;  %s1580_s3 = inlined_call_operand.hbm [shape: bf16[1536,128], index: 3, kind: input, shape index: {}]   ;;  %s1581_s4 = inlined_call_operand.vmem [shape: f32[3,1,128], index: 4, kind: input, shape index: {}]   ;;  %s1582_s5 = inlined_call_operand.hbm [shape: f32[3,2,128], index: 5, kind: output, shape index: {}]   ;;  %s1583_s1 = inlined_call_operand.hbm [shape: s32[3], index: 1, kind: input, shape index: {}]  }
   0x1   :  { %1594 = sst [smem:[#allocation35_spill]] %s1579_s2  ;;  %s11_s20 = sshll.u32 %s1578_s0, 4  ;;  %s12_s20 = int_to_ptr.hbm [resolvable:$true] %s11_s20 }
   0x2   :  { %1595 = sst [smem:[#allocation36_spill]] %s1581_s4  ;;  %s16_s23 = sshll.u32 %s1583_s1, 4  ;;  %s17_s23 = int_to_ptr.hbm [resolvable:$true] %s16_s23 }
   0x3   :  { %1596 = sst [smem:[#allocation37_spill]] %s1582_s5 }
   0x4   :  { %14 = dma.hbm_to_smem %s12_s20, 16, %s1152_s24, [#allocation3] }
   0x5   :  { %19 = dma.hbm_to_smem %s17_s23, 16, %s1153_s25, [#allocation3] }
   0x6   :  { %1082 = dma.done.wait [#allocation3], 32 }
   0x7   :  { %1083 = vsyncadd [#allocation3], 4294967264 }
   0x8   :  { %22 = sfence }
   0x9   :  { %23 = vsyncpa [#allocation7], 0 }
   0xa   :  { %25 = vsyncpa [#allocation7 + $0x1], 0 }
   0xb   :  { %26 = vsyncpa [#allocation10], 0 }
   0xc   :  { %28 = vsyncpa [#allocation10 + $0x1], 0 }
   0xd   :  { %29 = vsyncpa [#allocation8], 0 }
   0xe   :  { %31 = vsyncpa [#allocation8 + $0x1], 0  ;;  %s1192_s0 = smov 0   ;;  %s1194_s26 = smov 0  }
   0xf   :  { %s1196_s1 = smov 0   ;;  %s1198_s27 = smov 0  }
  0x10   :  { %s1200_s28 = smov 0   ;;  %s1202_s29 = smov 0  }
  0x11   :  { %s1204_s30 = smov 0   ;;  %s1206_s6 = smov 0  }
  0x12   :  { %s1208_s7 = smov 0   ;;  %s1210_s8 = smov 0  }
  0x13   :  { %s1212_s9 = smov 0   ;;  %s1214_s10 = smov 0  }
  0x14   :  { %s1216_s11 = smov 0   ;;  %s1218_s12 = smov 0  }
  0x15 LB: > { %1597 = sst [smem:[#allocation24_spill]] %s1106_s1  ;;  %s46_s13 = sadd.s32 1, %s1142_s10  ;;  %s1150_s12 = sphi %s1218_s12, %s37_s12   ;;  %s1146_s11 = sphi %s1216_s11, %s1645_s11   ;;  %s1142_s10 = sphi %s1214_s10, %s1655_s10   ;;  %s1138_s9 = sphi %s1212_s9, %s1643_s9   ;;  %s1134_s8 = sphi %s1210_s8, %s1654_s8   ;;  %s1130_s7 = sphi %s1208_s7, %s1653_s7   ;;  %s1126_s6 = sphi %s1206_s6, %s1652_s6   ;;  %s1122_s30 = sphi %s1204_s30, %s1651_s30   ;;  %s1118_s29 = sphi %s1202_s29, %s1650_s29   ;;  %s1114_s28 = sphi %s1200_s28, %s1649_s28   ;;  %s1110_s27 = sphi %s1198_s27, %s1648_s27   ;;  %s1106_s1 = sphi %s1196_s1, %s1639_s1   ;;  %s1102_s26 = sphi %s1194_s26, %s1647_s26   ;;  %s1098_s0 = sphi %s1192_s0, %s1646_s0  }
  0x16   : > { %1598 = sst [smem:[#allocation25_spill]] %s1130_s7  ;;  %p47_p0 = scmp.ge.s32.totalorder %s46_s13, 4 }
  0x17   : > { %1599 = sst [smem:[#allocation26_spill]] %s1134_s8  ;;  %s49_s14 = sadd.s32 1, %s1146_s11 }
  0x18   : > { %1600 = sst [smem:[#allocation27_spill]] %s1138_s9  ;;  %s1584_s15 = sadd.s32 4294967295, %s1150_s12  }
  0x19   : > { %1601 = sst [smem:[#allocation28_spill]] %s1146_s11  ;;  %s1657_s14 = smov (!%p47_p0, %s49_s14), %s1146_s11 }
  0x1a   : > { %s54_s16 = sld [smem:[#allocation5 + %s1146_s11]]  ;;  %s1659_s13 = smov (%p47_p0, %s46_s13), 0 }
  0x1b   : > { %s1266_s18 = sld [smem:[#allocation4 + %s1146_s11]]  ;;  %p51_p1 = scmp.ge.s32.totalorder %s1657_s14, 3 }
  0x1c   : > { %1602 = sst [smem:[#allocation29_spill]] %s1659_s13  ;;  %p81_p2 = scmp.ne.s32.totalorder %s1126_s6, %s1122_s30 }
  0x1d   : > { %p1275_p3 = scmp.eq.s32.totalorder %s1584_s15, 0  ;;  %s1661_s14 = smov (%p51_p1, %s1657_s14), 0 }
  0x1e   : > { %1604 = sst [smem:[#allocation30_spill]] %s1661_s14  ;;  %p75_p6 = scmp.ne.s32.totalorder %s1130_s7, %s1126_s6 }
  0x1f   : > { %p1283_p4 = por %p1275_p3, %p81_p2  ;;  %s59_s23 = sld [smem:[#allocation4 + %s1661_s14]] }
  0x20   : > { %s655_s21 = sadd.s32 4294967295, %s54_s16  ;;  %s60_s24 = sld [smem:[#allocation5 + %s1661_s14]] }
  0x21   : > { %p56_p5 = scmp.lt.s32.totalorder %s1142_s10, %s655_s21  ;;  %p76_p7 = scmp.eq.s32.totalorder %s1150_s12, 0 }
  0x22   : > { %s1295_s30 = sld [smem:[#allocation4 + %s1146_s11]]  ;;  %p119_p8 = scmp.ne.s32.totalorder %s1114_s28, %s1110_s27 }
  0x23   : > { %s57_s25 = scalar_select %p56_p5, %s1142_s10, %s655_s21 }
  0x24   : > { %s92_s16 = sld [smem:[#allocation5 + %s1146_s11]]  ;;  %s155_s4 = ssub.s32 %s1146_s11, %s1661_s14 }
  0x25   : > { %s58_s15 = sadd.s32 %s57_s25, %s1266_s18  ;;  %s97_s19 = sld [smem:[#allocation4 + %s1661_s14]] }
  0x26   : > { %s98_s5 = sld [smem:[#allocation5 + %s1661_s14]]  ;;  %s656_s8 = sadd.s32 4294967295, %s60_s24 }
  0x27   : > { %p62_p9 = scmp.lt.s32.totalorder %s1659_s13, %s656_s8  ;;  %p1309_p10 = por %p119_p8, %p1275_p3 }
  0x28   : > { %p1313_p11 = scmp.eq.s32.totalorder %s155_s4, 0  ;;  %s158_s27 = sadd.s32 1, %s1106_s1 }
  0x29   : > { %s63_s24 = scalar_select %p62_p9, %s1659_s13, %s656_s8 }
  0x2a   : > { %s657_s25 = sadd.s32 4294967295, %s92_s16  ;;  %p168_p12 = scmp.ne.s32.totalorder %s1106_s1, %s1102_s26 }
  0x2b   : > { %s64_s20 = sadd.s32 %s63_s24, %s59_s23  ;;  %p94_p13 = scmp.lt.s32.totalorder %s1142_s10, %s657_s25 }
  0x2c   : > { %s65_s17 = ssub.s32 %s58_s15, %s64_s20  ;;  %s658_s4 = sadd.s32 4294967295, %s98_s5 }
  0x2d   : > { %p66_p0 = scmp.eq.s32.totalorder %s65_s17, 0  ;;  %p100_p1 = scmp.lt.s32.totalorder %s1659_s13, %s658_s4 }
  0x2e   : > { %s95_s8 = scalar_select %p94_p13, %s1142_s10, %s657_s25 }
  0x2f   : > { %s1608_s14 = sadd.s32 1, %s1130_s7  ;;  %s1610_s23 = sadd.s32 4294967295, %s1150_s12  }
  0x30   : > { %s1327_s16 = scalar_select %p66_p0, %s1130_s7, %s1608_s14  }
  0x31   : > { %s96_s9 = sadd.s32 %s95_s8, %s1295_s30  ;;  %p169_p2 = scmp.eq.s32.totalorder %s1610_s23, 11 }
  0x32   : > { %1609 = sst [smem:[#allocation31_spill]] %s1327_s16  ;;  %p174_p5 = scmp.ne.s32.totalorder %s1102_s26, %s1098_s0 }
  0x33   : > { %s101_s15 = scalar_select %p100_p1, %s1659_s13, %s658_s4 }
  0x34   : > { %s1336_s5 = scalar_select %p1313_p11, %s1106_s1, %s158_s27  }
  0x35   : > { %s102_s17 = sadd.s32 %s101_s15, %s97_s19  ;;  %p1341_p3 = por %p169_p2, %p168_p12 }
  0x36   : > { %1611 = sst [smem:[#allocation32_spill]] %s1336_s5  ;;  %s103_s14 = ssub.s32 %s96_s9, %s102_s17 }
  0x37   : > { %p104_p8 = scmp.eq.s32.totalorder %s103_s14, 0  ;;  %s1613_s30 = sadd.s32 4294967294, %s1150_s12  }
  0x38   : > { %p175_p9 = scmp.eq.s32.totalorder %s1613_s30, 11  ;;  %s1614_s25 = sadd.s32 1, %s1118_s29 }
  0x39   : > { %s1352_s18 = scalar_select %p104_p8, %s1118_s29, %s1614_s25  }
  0x3a   : > { %p77_p11 = por %p76_p7, %p75_p6  ;;  %p1359_p13 = por %p175_p9, %p174_p5 }
  0x3b   : > { %1615 = sst [smem:[#allocation33_spill]] %s1352_s18  ;;  %p113_p12 = scmp.ne.s32.totalorder %s1118_s29, %s1114_s28 }
  0x3c   : > { %s1616_s19 = scalar_select %p1359_p13, 1, 0 }
  0x3d   : > { %p1593_p0 = scmp.lt.s32.totalorder %s1150_s12, 12  ;;  %s195_s20 = sand.u32 1, %s1130_s7  }
  0x3e   : > { %1617 = sst [smem:[#allocation34_spill]] %s1616_s19  ;;  %p1382_p6 = por %p113_p12, %p76_p7 }
  0x3f   : > { %s760_s9 = scalar_select %p77_p11, [#allocation4], [#allocation12] }
  0x40   : > { %s761_s27 = scalar_select %p77_p11, %s1146_s11, 0 }
  0x41   : > { %p1370_p1 = pnand %p1593_p0, %p77_p11  ;;  %s1665_s9 = smov (!%p1593_p0, %s760_s9), [#allocation16] }
  0x42   : > { %s1663_s27 = smov (!%p1593_p0, %s761_s27), 0  ;;  %s661_s15 = sshll.u32 %s195_s20, 1 }
  0x43   : > { %s762_s8 = scalar_select %p77_p11, [#allocation5], [#allocation13] }
  0x44   : > { %s200_s14 = sld [smem:[%s1665_s9 + %s1663_s27]]  ;;  %p1395_p2 = pnand %p1593_p0, %p1382_p6 }
  0x45   : > { %s1667_s8 = smov (!%p1593_p0, %s762_s8), [#allocation17]  ;;  %s199_s7 = scalar_lea.vmem [#allocation6], %s661_s15 }
  0x46   : > { %s201_s17 = sld [smem:[%s1667_s8 + %s1663_s27]]  ;;  %s213_s18 = sshll.u32 %s199_s7, 4  ;;  %s214_s18 = int_to_ptr.vmem [resolvable:$true] %s213_s18 }
  0x47   : > { %s766_s30 = scalar_select %p1382_p6, %s1146_s11, 0 }
  0x48   : > { %s1621_s2 = sld [smem:[#allocation35_spill]]  ;;  %s196_s1 = scalar_lea.sflag [#allocation7], %s195_s20 }
  0x49   : > { %s1669_s30 = smov (!%p1593_p0, %s766_s30), 0  ;;  %p942_p11 = pneg %p1370_p1 }
  0x4c   : > { %s662_s13 = sadd.s32 4294967295, %s201_s17 }
  0x4d   : > { %p203_p7 = scmp.lt.s32.totalorder %s1142_s10, %s662_s13 }
  0x4f   : > { %s204_s9 = scalar_select %p203_p7, %s1142_s10, %s662_s13 }
  0x51   : > { %s205_s27 = sadd.s32 %s204_s9, %s200_s14  ;;  %s945_s14 = scalar_lea.hbm %s1621_s2, 12 }
  0x52   : > { %s663_s8 = sshll.u32 %s205_s27, 1 }
  0x53   : > { %s209_s17 = scalar_lea.hbm %s1621_s2, %s663_s8 }
  0x54   : > { %s211_s5 = sshll.u32 %s209_s17, 4  ;;  %s212_s5 = int_to_ptr.hbm [resolvable:$true] %s211_s5 }
  0x55   : > { %s938_s19 = sshra.s32 %s212_s5, 4  ;;  %s939_s19 = int_to_ptr.hbm [resolvable:$true] %s938_s19 }
  0x56   : > { %s940_s7 = scalar_lea.hbm %s939_s19, 2  ;;  %p946_p0 = scmp.lt.s32.totalorder %s939_s19, %s1621_s2 }
  0x57   : > { %p941_p9 = scmp.ne.s32.totalorder %s939_s19, %s940_s7  ;;  %p947_p5 = scmp.lt.s32.totalorder %s945_s14, %s940_s7 }
  0x59   : > { %p943_p12 = pnand %p942_p11, %p941_p9  ;;  %p948_p8 = por %p947_p5, %p946_p0 }
  0x5b   : > { %p944_p7 = pneg %p943_p12 }
  0x5d   : > { %p949_p13 = pnand %p948_p8, %p944_p7 }
  0x5f   : > { %952 = shalt.err (!%p949_p13)
}
  0x60   : > { %781 = dma.hbm_to_vmem [thread:$0]  (!%p1370_p1), %s212_s5, 32, %s214_s18, %s196_s1  }
  0x61   : > { %s767_s19 = scalar_select %p1382_p6, [#allocation5], [#allocation15] }
  0x62   : > { %s220_s20 = sand.u32 1, %s1118_s29   ;;  %p1622_p0 = scmp.lt.s32.totalorder %s1150_s12, 13 }
  0x63   : > { %p1623_p5 = scmp.ge.s32.totalorder %s1150_s12, 1  ;;  %p1625_p8 = scmp.lt.s32.totalorder %s1150_s12, 12 }
  0x64   : > { %s1626_s4 = scalar_select %p1382_p6, [#allocation4], [#allocation14] }
  0x65   : > { %p1427_p13 = pnand %p1623_p5, %p1622_p0  ;;  %s1671_s19 = smov (!%p1625_p8, %s767_s19), [#allocation19] }
  0x66   : > { %p1627_p9 = pmov %p1625_p8  ;;  %s226_s27 = sld [smem:[%s1671_s19 + %s1669_s30]] }
  0x67   : > { %s664_s8 = sshll.u32 %s220_s20, 7  ;;  %s221_s19 = scalar_lea.sflag [#allocation10], %s220_s20 }
  0x68   : > { %s1673_s4 = smov (!%p1627_p9, %s1626_s4), [#allocation18]  ;;  %s224_s1 = scalar_lea.vmem [#allocation9], %s664_s8 }
  0x69   : > { %s225_s17 = sld [smem:[%s1673_s4 + %s1669_s30]]  ;;  %s1441_s5 = sshll.u32 %s224_s1, 4  ;;  %s239_s5 = int_to_ptr.vmem [resolvable:$true] %s1441_s5 }
  0x6a   : > { %p972_p11 = pneg %p1395_p2  ;;  %s975_s8 = scalar_lea.hbm %s1580_s3, 768 }
  0x6c   : > { %s665_s7 = sadd.s32 4294967295, %s226_s27 }
  0x6d   : > { %p228_p1 = scmp.lt.s32.totalorder %s1142_s10, %s665_s7 }
  0x6f   : > { %s229_s18 = scalar_select %p228_p1, %s1142_s10, %s665_s7 }
  0x71   : > { %s230_s13 = sadd.s32 %s229_s18, %s225_s17 }
  0x72   : > { %s743_s15 = sshll.u32 %s230_s13, 7 }
  0x73   : > { %s235_s23 = scalar_lea.hbm %s1580_s3, %s743_s15 }
  0x74   : > { %s236_s11 = sshll.u32 %s235_s23, 4  ;;  %s237_s11 = int_to_ptr.hbm [resolvable:$true] %s236_s11 }
  0x75   : > { %s968_s2 = sshra.s32 %s237_s11, 4  ;;  %s969_s2 = int_to_ptr.hbm [resolvable:$true] %s968_s2 }
  0x76   : > { %s970_s30 = scalar_lea.hbm %s969_s2, 128  ;;  %p976_p0 = scmp.lt.s32.totalorder %s969_s2, %s1580_s3 }
  0x77   : > { %p971_p6 = scmp.ne.s32.totalorder %s969_s2, %s970_s30  ;;  %p977_p5 = scmp.lt.s32.totalorder %s975_s8, %s970_s30 }
  0x79   : > { %p973_p12 = pnand %p972_p11, %p971_p6  ;;  %p978_p8 = por %p977_p5, %p976_p0 }
  0x7b   : > { %p974_p7 = pneg %p973_p12 }
  0x7d   : > { %p979_p9 = pnand %p978_p8, %p974_p7 }
  0x7f   : > { %982 = shalt.err (!%p979_p9)
}
  0x80   : > { %s1154_s20 = smov 64   ;;  %s1155_s1 = smov 4  }
  0x81   : > { %788 = dma.hbm_to_vmem [thread:$0]  (!%p1395_p2), %s237_s11, 2048, %s239_s5, %s221_s19, %s1154_s20, %s1154_s20, %s1155_s1  }
  0x82   : > { %256 = sbr.rel (%p1427_p13) target bundleno = 514 (0x202), region = 32  ;;  %s258_s18 = sand.u32 (!%p1427_p13), 1, %s1126_s6  }
  0x83   : > { %s1461_s13 = sshll.u32 (!%p1427_p13), %s258_s18, 1  ;;  %s259_s15 = scalar_lea.sflag (!%p1427_p13), [#allocation7], %s258_s18 }
  0x84   : > { %s262_s2 = scalar_lea.vmem (!%p1427_p13), [#allocation6], %s1461_s13 }
  0x87   : > { %1085 = dma.done.wait (%p1283_p4), %s259_s15, 32  }
  0x88   : > { %1087 = vsyncadd (%p1283_p4), %s259_s15, 4294967264  ;;  %s268_s16 = sand.u32 1, %s1114_s28  }
  0x89   : > { %s670_s5 = sshll.u32 %s268_s16, 7  ;;  %s269_s14 = scalar_lea.sflag [#allocation10], %s268_s16 }
  0x8a   : > { %s1469_s25 = scalar_lea.vmem [#allocation9], %s670_s5 }
  0x8b   : > { %1089 = dma.done.wait (%p1309_p10), %s269_s14, 2048  }
  0x8c   : > { %1091 = vsyncadd (%p1309_p10), %s269_s14, 4294965248  ;;  %s1628_s9 = sld [smem:[#allocation27_spill]]  ;;  %s301_s23 = sand.u32 1, %s1102_s26  }
  0x8d   : > { %s1480_s11 = sshll.u32 %s301_s23, 1  ;;  %s1629_s4 = sld [smem:[#allocation36_spill]] }
  0x8e   : > { %s303_s8 = scalar_lea.vmem [#allocation11], %s1480_s11  ;;  %s1630_s21 = sld [smem:[#allocation26_spill]] }
  0x92   : > { %p318_p2 = scmp.lt.s32.totalorder %s1628_s9, 2  ;;  %s321_s22 = sld [smem:[#allocation5 + %s1628_s9]] }
  0x94   : > { %s1675_s9 = smov (!%p318_p2, %s1628_s9), 2  ;;  %p672_p4 = scmp.ne.s32.totalorder %s1630_s21, 0 }
  0x95   : > { %s320_s27 = scalar_lea.vmem %s1629_s4, %s1675_s9 }
  0x96   : > { %325 = sbr.rel (%p672_p4) target bundleno = 157 (0x9d), region = 44 }
  0x9b   : > { %v911_v0 = vld [vmem:[%s320_s27] ss:$0 sm:$0xff] }
  0x9c   : > { %330 = vst [vmem:[#allocation2] sm:$0x3] %v911_v0 }
  0x9d PF: > { %s1631_s17 = sld [smem:[#allocation26_spill]] }
  0xa3   : > { %p673_p10 = scmp.ge.s32.totalorder %s1631_s17, %s321_s22 }
  0xa5   : > { %334 = sbr.rel (%p673_p10) target bundleno = 337 (0x151), region = 48 }
  0xaa   : > { %v751_v1 = vld [vmem:[%s1469_s25 + $0x38] sm:$0xff]  ;;  %v750_v3 = vld [vmem:[%s1469_s25 + $0x30] sm:$0xff]  ;;  %v749_v6 = vld [vmem:[%s1469_s25 + $0x28] sm:$0xff] }
  0xab   : > { %v759_v2 = vld [vmem:[%s1469_s25 + $0x78] sm:$0xff]  ;;  %471 = vmatpush.bf16.msra.mxu0 %v751_v1  ;;  %v758_v4 = vld [vmem:[%s1469_s25 + $0x70] sm:$0xff]  ;;  %v757_v7 = vld [vmem:[%s1469_s25 + $0x68] sm:$0xff] }
  0xac   : > { %484 = vmatpush.bf16.msra.mxu1 %v759_v2  ;;  %v336_v5 = vld [vmem:[%s262_s2] sm:$0x3]  ;;  %v748_v8 = vld [vmem:[%s1469_s25 + $0x20] sm:$0xff]  ;;  %v746_v12 = vld [vmem:[%s1469_s25 + $0x10] sm:$0xff] }
  0xad   : > { %370 = vst [vmem:[#allocation1] ss:$9 sm:$0xff] %v336_v5  ;;  %v756_v9 = vld [vmem:[%s1469_s25 + $0x60] sm:$0xff]  ;;  %v747_v10 = vld [vmem:[%s1469_s25 + $0x18] sm:$0xff]  ;;  %v754_v13 = vld [vmem:[%s1469_s25 + $0x50] sm:$0xff] }
  0xae   : > { %v755_v11 = vld [vmem:[%s1469_s25 + $0x58] sm:$0xff]  ;;  %v745_v14 = vld [vmem:[%s1469_s25 + $0x8] sm:$0xff]  ;;  %v744_v16 = vld [vmem:[%s1469_s25] sm:$0xff] }
  0xaf   : > { %472 = vmatpush.bf16.msra.mxu0 %v750_v3  ;;  %v753_v15 = vld [vmem:[%s1469_s25 + $0x48] sm:$0xff]  ;;  %v752_v17 = vld [vmem:[%s1469_s25 + $0x40] sm:$0xff]  ;;  %v335_v21 = vld [vmem:[#allocation2] sm:$0x3] }
  0xb0   : > { %485 = vmatpush.bf16.msra.mxu1 %v758_v4 }
  0xb3   : > { %473 = vmatpush.bf16.msra.mxu0 %v749_v6 }
  0xb4   : > { %486 = vmatpush.bf16.msra.mxu1 %v757_v7  ;;  %v371_v18 = vld [vmem:[#allocation1] sm:$0xff]  ;;  %v372_v19 = vld [vmem:[#allocation1 + $0x9] sm:$0xff] }
  0xb7   : > { %474 = vmatpush.bf16.msra.mxu0 %v748_v8 }
  0xb8   : > { %487 = vmatpush.bf16.msra.mxu1 %v756_v9 }
  0xbb   : > { %475 = vmatpush.bf16.msra.mxu0 %v747_v10 }
  0xbc   : > { %488 = vmatpush.bf16.msra.mxu1 %v755_v11 }
  0xbf   : > { %476 = vmatpush.bf16.msra.mxu0 %v746_v12 }
  0xc0   : > { %489 = vmatpush.bf16.msra.mxu1 %v754_v13 }
  0xc3   : > { %477 = vmatpush.bf16.msra.mxu0 %v745_v14 }
  0xc4   : > { %490 = vmatpush.bf16.msra.mxu1 %v753_v15 }
  0xc7   : > { %478 = vmatpush.bf16.msra.mxu0 %v744_v16 }
  0xc8   : > { %491 = vmatpush.bf16.msra.mxu1 %v752_v17 }
  0xca   : > { %479 = vmatmul.bf16.vlgmr.msra.gmra.mxu0 %v371_v18 }
  0xcb   : > { %492 = vmatmul.bf16.vlgmr.msra.gmra.mxu1 %v372_v19 }
 0x147   : > { %v480_v20 = vpop.f32.mrf.mxu0 }
 0x148   : > { %v493_v22 = vpop.f32.mrf.mxu1 }
 0x149   : > { %v494_v23 = vadd.f32 %v493_v22, %v480_v20 }
 0x14b   : > { %v497_v24 = vadd.f32 %v494_v23, %v335_v21 }
 0x14d   : > { %498 = vst [vmem:[#allocation2] sm:$0x3] %v497_v24 }
 0x14f   : > { %v482_v25 = vpop.f32.mrf.mxu0 }
 0x150   : > { %v495_v26 = vpop.f32.mrf.mxu1 }
 0x151 PF: > { %s1632_s7 = sld [smem:[#allocation26_spill]] }
 0x157   : > { %p738_p13 = scmp.ne.s32.totalorder %s1632_s7, 3 }
 0x159   : > { %502 = sbr.rel (%p738_p13) target bundleno = 493 (0x1ed), region = 52 }
 0x15e   : > { %v503_v27 = vld [vmem:[#allocation2] sm:$0x3]  ;;  %vm505_vm0 = vcmask 1041408  }
 0x15f   : > { %v504_v28 = vmul.f32 %v503_v27, %v503_v27 }
 0x161   : > { %v506_v29 = vsel %vm505_vm0, %v504_v28, 0.0 }
 0x162   : > { %507 = vadd.xlane.f32.xlu0 %v506_v29 }
 0x1d5   : > { %v508_v30 = vpop.xlane.xlu0 %507 }
 0x1d6   : > { %v509_v31 = vmax.f32 %v508_v30, 1e-24 }
 0x1d8   : > { %912 = vrsqrt.f32 %v509_v31  ;;  %vm516_vm2 = vweird.f32 %v509_v31 }
 0x1de   : > { %v913_v32 = vpop.eup %912 }
 0x1df   : > { %v511_v33 = vmul.f32 %v913_v32, %v509_v31  ;;  %vm517_vm1 = vweird.f32 %v913_v32 }
 0x1e0   : > { %vm518_vm3 = vmor %vm516_vm2, %vm517_vm1 }
 0x1e1   : > { %v512_v34 = vmul.f32 %v913_v32, %v511_v33 }
 0x1e3   : > { %v513_v35 = vmul.f32 0.5, %v512_v34 }
 0x1e5   : > { %v514_v36 = vsub.f32 1.5, %v513_v35 }
 0x1e7   : > { %v515_v37 = vmul.f32 %v913_v32, %v514_v36 }
 0x1e9   : > { %v519_v38 = vsel %vm518_vm3, %v913_v32, %v515_v37 }
 0x1ea   : > { %v520_v39 = vmul.f32 %v519_v38, %v503_v27 }
 0x1ec   : > { %521 = vst [vmem:[%s303_s8] sm:$0x3] %v520_v39 }
 0x1ed PF: > { %s1633_s20 = sld [smem:[#allocation27_spill]]  ;;  %s535_s16 = sshll.u32 %s303_s8, 4  ;;  %s536_s16 = int_to_ptr.vmem [resolvable:$true] %s535_s16 }
 0x1ee   : > { %s1634_s15 = sld [smem:[#allocation37_spill]]  ;;  %s523_s14 = scalar_lea.sflag [#allocation8], %s301_s23 }
 0x1f3   : > { %s740_s1 = sshll.u32 %s1633_s20, 1 }
 0x1f4   : > { %s533_s2 = scalar_lea.hbm %s1634_s15, %s740_s1  ;;  %s1018_s30 = scalar_lea.hbm %s1634_s15, 6 }
 0x1f5   : > { %s537_s5 = sshll.u32 %s533_s2, 4  ;;  %s538_s5 = int_to_ptr.hbm [resolvable:$true] %s537_s5 }
 0x1f6   : > { %s1012_s25 = sshra.s32 %s538_s5, 4  ;;  %s1013_s25 = int_to_ptr.hbm [resolvable:$true] %s1012_s25 }
 0x1f7   : > { %s1014_s9 = scalar_lea.hbm %s1013_s25, 2  ;;  %p1019_p12 = scmp.lt.s32.totalorder %s1013_s25, %s1634_s15 }
 0x1f8   : > { %p1015_p1 = scmp.ne.s32.totalorder %s1013_s25, %s1014_s9  ;;  %p1020_p7 = scmp.lt.s32.totalorder %s1018_s30, %s1014_s9 }
 0x1fa   : > { %p1016_p6 = pnand %p1015_p1, %p1341_p3  ;;  %p1021_p0 = por %p1020_p7, %p1019_p12 }
 0x1fc   : > { %p1017_p11 = pneg %p1016_p6 }
 0x1fe   : > { %p1022_p5 = pnand %p1021_p0, %p1017_p11 }
 0x200   : > { %1025 = shalt.err (!%p1022_p5)
}
 0x201   : > { %772 = dma.vmem_to_hbm [thread:$0]  (%p1341_p3), %s536_s16, 32, %s538_s5, %s523_s14  }
 0x202 PF: > { %s1635_s23 = sld [smem:[#allocation34_spill]]  ;;  %p794_p8 = scmp.ge.s32.totalorder %s1150_s12, 2 }
 0x203   : > { %s549_s11 = sand.u32 1, %s1098_s0  }
 0x204   : > { %s550_s8 = scalar_lea.sflag [#allocation8], %s549_s11 }
 0x208   : > { %p1636_p9 = scmp.ne.s32.totalorder %s1635_s23, 0 }
 0x20a   : > { %p790_p2 = pnand %p794_p8, %p1636_p9 }
 0x20c   : > { %p791_p4 = pneg %p790_p2 }
 0x20e   : > { %1093 = dma.done.wait (%p791_p4), %s550_s8, 32  }
 0x20f   : > { %1095 = vsyncadd (%p791_p4), %s550_s8, 4294967264  ;;  %s37_s12 = sadd.s32 1, %s1150_s12   ;;  %s1638_s24 = sld [smem:[#allocation24_spill]] }
 0x210   : > { %p1531_p10 = scmp.ge.s32.totalorder %s37_s12, 14   ;;  %s1639_s1 = sld [smem:[#allocation32_spill]] }
 0x211   : > { %s1640_s17 = sld [smem:[#allocation33_spill]]  ;;  %s1646_s0 = smov %s1102_s26 }
 0x212   : > { %s1641_s7 = sld [smem:[#allocation25_spill]]  ;;  %s1648_s27 = smov %s1114_s28 }
 0x213   : > { %s1642_s20 = sld [smem:[#allocation31_spill]]  ;;  %s1649_s28 = smov %s1118_s29 }
 0x214   : > { %s1643_s9 = sld [smem:[#allocation28_spill]]  ;;  %s1651_s30 = smov %s1126_s6 }
 0x215   : > { %s1644_s18 = sld [smem:[#allocation29_spill]]  ;;  %s1647_s26 = smov %s1638_s24 }
 0x216   : > { %s1645_s11 = sld [smem:[#allocation30_spill]]  ;;  %s1654_s8 = smov %s1142_s10 }
 0x217   : > { %s1650_s29 = smov %s1640_s17  ;;  %36 = sbr.rel (!%p1531_p10) target bundleno = 21 (0x15), region = 105 }
 0x218   : > { %s1652_s6 = smov %s1641_s7 }
 0x219   : > { %s1653_s7 = smov %s1642_s20 }
 0x21b   : > { %s1655_s10 = smov %s1644_s18 }
 0x21c   :  { %556 = vsyncpa [#allocation7], 1 }
 0x21d   :  { %558 = vsyncpa [#allocation7 + $0x1], 1 }
 0x21e   :  { %559 = vsyncpa [#allocation10], 1 }
 0x21f   :  { %561 = vsyncpa [#allocation10 + $0x1], 1 }
 0x220   :  { %562 = vsyncpa [#allocation8], 1 }
 0x221   :  { %564 = vsyncpa [#allocation8 + $0x1], 1 }

</bundles_post_ra>
